<compile_context>
chip_gen: v7x
topology: tpu7x:2x2x1
jax: 0.10.0
libtpu: 0.0.40
codegen_flags: <defaults>
</compile_context>

<pallas_src>
import functools
from typing import NamedTuple

import jax
import jax.numpy as jnp
from jax.experimental import pallas as pl
from jax.experimental.pallas import tpu as pltpu


def _round_up(x: int, m: int) -> int:
    return ((x + m - 1) // m) * m


class ClassifierHeadParams(NamedTuple):
    w: jax.Array          # (Kp, Np) bf16, pre-transposed + padded
    b: jax.Array          # (1, Np) f32, padded
    in_dim: int
    num_classes: int


def prepare_params(weight, bias) -> ClassifierHeadParams:
    """One-time (init) preparation of the PyTorch-layout parameters.

    weight: (num_classes, in_dim) f32, bias: (num_classes,) f32.
    Transposes to (in_dim, num_classes), pads both dims to multiples of 128,
    and casts the weight to bf16 so the hot path streams half the bytes.
    """
    weight = jnp.asarray(weight, jnp.float32)
    bias = jnp.asarray(bias, jnp.float32)
    n, k = weight.shape
    kp = _round_up(k, 128)
    np_ = _round_up(n, 128)
    w_t = weight.T                                  # (in_dim, num_classes)
    if (kp, np_) != (k, n):
        w_t = jnp.pad(w_t, ((0, kp - k), (0, np_ - n)))
    b = bias if np_ == n else jnp.pad(bias, (0, np_ - n))
    return ClassifierHeadParams(
        w=w_t.astype(jnp.bfloat16), b=b.reshape(1, np_), in_dim=k, num_classes=n
    )


def _classifier_head_kernel(x_ref, w_ref, b_ref, o_ref, *, act: str,
                            n_valid: int):
    # x_ref: (tm, tk) f32, w_ref: (tk, Np) bf16, b_ref: (1, Np) f32,
    # o_ref: (tm, Np) f32 — resident across the K axis (acts as accumulator).
    k = pl.program_id(1)

    @pl.when(k == 0)
    def _():
        # Fold the bias into the accumulator init.
        o_ref[...] = jnp.broadcast_to(b_ref[...], o_ref.shape)

    o_ref[...] += jnp.dot(
        x_ref[...].astype(jnp.bfloat16), w_ref[...],
        preferred_element_type=jnp.float32,
    )

    @pl.when(k == pl.num_programs(1) - 1)
    def _():
        logits = o_ref[...]
        if act == "softmax":
            # Mask padded class columns so the row-wise max/sum are correct.
            cols = jax.lax.broadcasted_iota(jnp.int32, logits.shape, 1)
            masked = jnp.where(cols < n_valid, logits, -jnp.inf)
            m = jnp.max(masked, axis=1, keepdims=True)
            e = jnp.exp(masked - m)
            o_ref[...] = e / jnp.sum(e, axis=1, keepdims=True)
        elif act == "sigmoid":
            o_ref[...] = jax.nn.sigmoid(logits)
        # else: identity — logits already in o_ref.


def _choose_tk(kp: int, np_: int, tm: int, target: int = 512,
               budget: int = 24 * 1024 * 1024) -> int:
    """Largest multiple of 128 that divides Kp, is <= target, and keeps the
    per-step double-buffered VMEM footprint under `budget`."""
    best = 128
    t = 128
    while t <= min(target, kp):
        if kp % t == 0:
            need = (2 * tm * t * 4          # x tile, f32, double-buffered
                    + 2 * t * np_ * 2       # W tile, bf16, double-buffered
                    + 2 * tm * np_ * 4      # out tile, f32, double-buffered
                    + 2 * np_ * 4)          # bias
            if need <= budget:
                best = t
        t += 128
    return best


def classifier_head(x, params: ClassifierHeadParams, act: str = "sigmoid", *,
                    tm: int = 128):
    """x: (B, in_dim) f32. Returns act(x @ W.T + b) with shape (B, num_classes)."""
    B, K = x.shape
    assert K == params.in_dim, "x feature dim must match weight in_dim"
    Kp, Np = params.w.shape
    N = params.num_classes

    # Row-tile: multiple of 8 (sublane), default 128 so typical batches give
    # >=2 blocks on the "parallel" axis (v7x megacore).
    tm = min(tm, _round_up(B, 8))
    Bp = _round_up(B, tm)
    tk = _choose_tk(Kp, Np, tm)

    # Pad x only when needed; K is padded only to the 128-aligned Kp (tk
    # divides Kp, so no per-call padding up to the tile size).
    xp = x if (Bp, Kp) == (B, K) else jnp.pad(x, ((0, Bp - B), (0, Kp - K)))

    grid = (Bp // tm, Kp // tk)
    kernel = functools.partial(_classifier_head_kernel, act=act, n_valid=N)

    out_p = pl.pallas_call(
        kernel,
        out_shape=jax.ShapeDtypeStruct((Bp, Np), jnp.float32),
        grid_spec=pltpu.PrefetchScalarGridSpec(
            num_scalar_prefetch=0,
            grid=grid,
            in_specs=[
                pl.BlockSpec((tm, tk), lambda i, k: (i, k)),   # x tile
                pl.BlockSpec((tk, Np), lambda i, k: (k, 0)),   # W tile (bf16)
                pl.BlockSpec((1, Np), lambda i, k: (0, 0)),    # bias
            ],
            out_specs=pl.BlockSpec((tm, Np), lambda i, k: (i, 0)),
        ),
        compiler_params=pltpu.CompilerParams(
            dimension_semantics=("parallel", "arbitrary"),
        ),
    )(xp, params.w, params.b)

    return out_p[:B, :N]


def _xavier_uniform(key, shape):
    # nn.init.xavier_uniform_ for a (out_features, in_features) Linear weight.
    fan_out, fan_in = shape
    bound = (6.0 / (fan_in + fan_out)) ** 0.5
    return jax.random.uniform(key, shape, jnp.float32, -bound, bound)


def _reference_logits(x, weight, bias):
    # Mirror the kernel's numerics: bf16 operands, f32 accumulation.
    return jnp.dot(x.astype(jnp.bfloat16), weight.T.astype(jnp.bfloat16),
                   preferred_element_type=jnp.float32) + bias


def _check(x, weight, bias):
    params = prepare_params(weight, bias)
    logits_ref = _reference_logits(x, weight, bias)
    tol = dict(atol=5e-3, rtol=5e-3)

    # Default module config: act='sigmoid' (element-wise sigmoid intent).
    out = jax.block_until_ready(classifier_head(x, params, act="sigmoid"))
    ref = jax.nn.sigmoid(logits_ref)
    assert out.shape == ref.shape
    assert jnp.allclose(out, ref, **tol), "sigmoid mismatch"

    # softmax path
    out_sm = jax.block_until_ready(classifier_head(x, params, act="softmax"))
    ref_sm = jax.nn.softmax(logits_ref, axis=1)
    assert jnp.allclose(out_sm, ref_sm, **tol), "softmax mismatch"

    # identity path
    out_id = jax.block_until_ready(classifier_head(x, params, act=""))
    assert jnp.allclose(out_id, logits_ref, **tol), "identity mismatch"


if __name__ == "__main__":
    key = jax.random.PRNGKey(0)
    k_x, k_w, k_x2, k_w2 = jax.random.split(key, 4)

    # Small shapes consistent with the module (previous-layer out_dim=32).
    B, in_dim, num_classes = 8, 32, 16
    x = jax.random.normal(k_x, (B, in_dim), jnp.float32)
    weight = _xavier_uniform(k_w, (num_classes, in_dim))
    bias = jnp.full((num_classes,), 0.01, jnp.float32)
    _check(x, weight, bias)

    # Ragged shape exercising multi-step K reduction, batch/class padding,
    # lane-dense padded output, and the bf16 weight stream.
    B2, in_dim2, num_classes2 = 64, 1536, 200
    x2 = jax.random.normal(k_x2, (B2, in_dim2), jnp.float32)
    weight2 = _xavier_uniform(k_w2, (num_classes2, in_dim2))
    bias2 = jnp.full((num_classes2,), 0.01, jnp.float32)
    _check(x2, weight2, bias2)

    print("KERNEL_OK")
</pallas_src>

<mosaic_0001>
module attributes {stable_mosaic.version = 11 : i64} {
  func.func @_classifier_head_kernel(%arg0: i32, %arg1: i32, %arg2: memref<8x128xf32, #tpu.memory_space<vmem>>, %arg3: memref<128x128xbf16, #tpu.memory_space<vmem>>, %arg4: memref<1x128xf32, #tpu.memory_space<vmem>>, %arg5: memref<8x128xf32, #tpu.memory_space<vmem>>) attributes {dimension_semantics = [#tpu.dimension_semantics<parallel>, #tpu.dimension_semantics<arbitrary>], iteration_bounds = array<i64: 1, 1>, scalar_prefetch = 0 : i64, scratch_operands = 0 : i64, tpu.core_type = #tpu.core_type<tc>, window_params = [{transform_indices = @transform_0, window_bounds = array<i64: 8, 128>}, {transform_indices = @transform_1, window_bounds = array<i64: 128, 128>}, {pipeline_mode = #tpu.pipeline_mode<synchronous>, transform_indices = @transform_2, window_bounds = array<i64: 1, 128>}, {transform_indices = @transform_3, window_bounds = array<i64: 8, 128>}]} {
    %c0_i32 = arith.constant 0 : i32
    %0 = arith.cmpi eq, %arg1, %c0_i32 : i32
    %1 = arith.extui %0 : i1 to i32
    %c0_i32_0 = arith.constant 0 : i32
    %2 = arith.cmpi ne, %1, %c0_i32_0 : i32
    scf.if %2 {
      %c0_10 = arith.constant 0 : index
      %c0_11 = arith.constant 0 : index
      %13 = vector.load %arg4[%c0_10, %c0_11] : memref<1x128xf32, #tpu.memory_space<vmem>>, vector<1x128xf32>
      %14 = vector.shape_cast %13 : vector<1x128xf32> to vector<1x128xf32>
      %15 = vector.broadcast %14 : vector<1x128xf32> to vector<8x128xf32>
      %c0_12 = arith.constant 0 : index
      %c0_13 = arith.constant 0 : index
      %16 = vector.load %arg5[%c0_12, %c0_13] : memref<8x128xf32, #tpu.memory_space<vmem>>, vector<8x128xf32>
      tpu.vector_store %arg5[%c0_12, %c0_13], %15 {strides = array<i32>} : memref<8x128xf32, #tpu.memory_space<vmem>>, vector<8x128xf32>,
    } else {
    }
    %c0 = arith.constant 0 : index
    %c0_1 = arith.constant 0 : index
    %3 = vector.load %arg5[%c0, %c0_1] : memref<8x128xf32, #tpu.memory_space<vmem>>, vector<8x128xf32>
    %c0_2 = arith.constant 0 : index
    %c0_3 = arith.constant 0 : index
    %4 = vector.load %arg2[%c0_2, %c0_3] : memref<8x128xf32, #tpu.memory_space<vmem>>, vector<8x128xf32>
    %5 = arith.truncf %4 : vector<8x128xf32> to vector<8x128xbf16>
    %c0_4 = arith.constant 0 : index
    %c0_5 = arith.constant 0 : index
    %6 = vector.load %arg3[%c0_4, %c0_5] : memref<128x128xbf16, #tpu.memory_space<vmem>>, vector<128x128xbf16>
    %cst = arith.constant dense<0.000000e+00> : vector<8x128xf32>
    %7 = tpu.matmul %5, %6, %cst {dimension_numbers = #tpu.dot_dimension_numbers<[1], [0], [0], [1], [0, 0, 1, 1], [], []>} : vector<8x128xbf16>, vector<128x128xbf16>, vector<8x128xf32> -> vector<8x128xf32>
    %8 = arith.addf %3, %7 : vector<8x128xf32>
    %c0_6 = arith.constant 0 : index
    %c0_7 = arith.constant 0 : index
    %9 = vector.load %arg5[%c0_6, %c0_7] : memref<8x128xf32, #tpu.memory_space<vmem>>, vector<8x128xf32>
    tpu.vector_store %arg5[%c0_6, %c0_7], %8 {strides = array<i32>} : memref<8x128xf32, #tpu.memory_space<vmem>>, vector<8x128xf32>,
    %c0_i32_8 = arith.constant 0 : i32
    %10 = arith.cmpi eq, %arg1, %c0_i32_8 : i32
    %11 = arith.extui %10 : i1 to i32
    %c0_i32_9 = arith.constant 0 : i32
    %12 = arith.cmpi ne, %11, %c0_i32_9 : i32
    scf.if %12 {
      %c0_10 = arith.constant 0 : index
      %c0_11 = arith.constant 0 : index
      %13 = vector.load %arg5[%c0_10, %c0_11] : memref<8x128xf32, #tpu.memory_space<vmem>>, vector<8x128xf32>
      %14 = arith.negf %13 : vector<8x128xf32>
      %15 = math.exp %14 : vector<8x128xf32>
      %cst_12 = arith.constant 1.000000e+00 : f32
      %16 = vector.broadcast %cst_12 : f32 to vector<8x128xf32>
      %17 = arith.addf %16, %15 : vector<8x128xf32>
      %18 = arith.divf %16, %17 : vector<8x128xf32>
      %c0_13 = arith.constant 0 : index
      %c0_14 = arith.constant 0 : index
      %19 = vector.load %arg5[%c0_13, %c0_14] : memref<8x128xf32, #tpu.memory_space<vmem>>, vector<8x128xf32>
      tpu.vector_store %arg5[%c0_13, %c0_14], %18 {strides = array<i32>} : memref<8x128xf32, #tpu.memory_space<vmem>>, vector<8x128xf32>,
    } else {
    }
    return
  }
  func.func @transform_0(%arg0: i32, %arg1: i32) -> (i32, i32) {
    %c0_i32 = arith.constant 0 : i32
    return %arg0, %arg1 : i32, i32
  }
  func.func @transform_1(%arg0: i32, %arg1: i32) -> (i32, i32) {
    %c0_i32 = arith.constant 0 : i32
    %c0_i32_0 = arith.constant 0 : i32
    return %arg1, %c0_i32 : i32, i32
  }
  func.func @transform_2(%arg0: i32, %arg1: i32) -> (i32, i32) {
    %c0_i32 = arith.constant 0 : i32
    %c0_i32_0 = arith.constant 0 : i32
    %c0_i32_1 = arith.constant 0 : i32
    return %c0_i32, %c0_i32_0 : i32, i32
  }
  func.func @transform_3(%arg0: i32, %arg1: i32) -> (i32, i32) {
    %c0_i32 = arith.constant 0 : i32
    %c0_i32_0 = arith.constant 0 : i32
    return %arg0, %c0_i32 : i32, i32
  }
}

</mosaic_0001>

<bundles_post_ra>
// kernel: tpu_custom_call.1
= control target key start
LH: loop header
LB: loop body
LE: loop exit
PB: predicated region body
PF: predicated region fallthrough
CT: control target
= control target key end

     0   :  { %8 = vsyncpa [#allocation3], 0  ;;  %s393_s0 = inlined_call_operand.hbm [shape: f32[8,128], index: 0, kind: input, shape index: {}]   ;;  %s394_s1 = inlined_call_operand.hbm [shape: bf16[128,128], index: 1, kind: input, shape index: {}]   ;;  %s395_s2 = inlined_call_operand.vmem [shape: f32[1,128], index: 2, kind: input, shape index: {}]   ;;  %s396_s3 = inlined_call_operand.hbm [shape: f32[8,128], index: 3, kind: output, shape index: {}]  }
   0x1   :  { %9 = vsyncpa [#allocation6], 0 }
   0x2   :  { %10 = vsyncpa [#allocation4], 0  ;;  %s320_s12 = smov [#allocation2]   ;;  %s321_s14 = smov [#allocation5]  }
   0x3   :  { %s17_s13 = sshll.u32 %s320_s12, 4  ;;  %s26_s15 = sshll.u32 %s321_s14, 4  ;;  %s18_s13 = int_to_ptr.vmem [resolvable:$true] %s17_s13  ;;  %s347_s15 = int_to_ptr.vmem [resolvable:$true] %s26_s15 }
   0x4   :  { %s248_s18 = scalar_lea.hbm %s393_s0, 128 }
   0x5   :  { %p249_p0 = scmp.ne.s32.totalorder %s393_s0, %s248_s18  ;;  %p252_p1 = scmp.lt.u32.totalorder %s248_s18, %s393_s0 }
   0x7   :  { %p254_p2 = pnand %p252_p1, %p249_p0 }
   0x9   :  { %257 = shalt.err (!%p254_p2)
}
   0xa   :  { %s258_s23 = scalar_lea.vmem %s18_s13, 128  ;;  %p263_p4 = scmp.lt.s32.totalorder %s18_s13, %s18_s13 }
   0xb   :  { %p259_p3 = scmp.ne.s32.totalorder %s18_s13, %s258_s23  ;;  %p264_p5 = scmp.lt.s32.totalorder %s258_s23, %s258_s23 }
   0xd   :  { %p265_p6 = por %p264_p5, %p263_p4 }
   0xf   :  { %p266_p7 = pnand %p265_p6, %p259_p3 }
  0x11   :  { %269 = shalt.err (!%p266_p7)
}
  0x12   :  { %20 = dma.hbm_to_vmem [thread:$0]  %s393_s0, 128, %s18_s13, [#allocation3]  }
  0x13   :  { %s270_s28 = scalar_lea.hbm %s394_s1, 1024 }
  0x14   :  { %p271_p8 = scmp.ne.s32.totalorder %s394_s1, %s270_s28  ;;  %p274_p9 = scmp.lt.u32.totalorder %s270_s28, %s394_s1 }
  0x16   :  { %p276_p10 = pnand %p274_p9, %p271_p8 }
  0x18   :  { %279 = shalt.err (!%p276_p10)
}
  0x19   :  { %s280_s6 = scalar_lea.vmem %s347_s15, 1024  ;;  %p285_p12 = scmp.lt.s32.totalorder %s347_s15, %s347_s15 }
  0x1a   :  { %p281_p11 = scmp.ne.s32.totalorder %s347_s15, %s280_s6  ;;  %p286_p13 = scmp.lt.s32.totalorder %s280_s6, %s280_s6 }
  0x1c   :  { %p287_p0 = por %p286_p13, %p285_p12 }
  0x1e   :  { %p288_p1 = pnand %p287_p0, %p281_p11 }
  0x20   :  { %291 = shalt.err (!%p288_p1)
}
  0x21   :  { %s322_s0 = smov 64   ;;  %s323_s7 = smov 4  }
  0x22   :  { %32 = dma.hbm_to_vmem [thread:$0]  %s394_s1, 1024, %s347_s15, [#allocation6], %s322_s0, %s322_s0, %s323_s7  }
  0x23   :  { %314 = dma.done.wait [#allocation3], 128  }
  0x24   :  { %315 = vsyncadd [#allocation3], 4294967168 }
  0x25   :  { %316 = dma.done.wait [#allocation6], 1024  }
  0x26   :  { %317 = vsyncadd [#allocation6], 4294966272  ;;  %v324_v0 = vmov 0.0   ;;  %vm325_vm0 = vmmov 0   ;;  %v236_v1 = vld [vmem:[#allocation5] sm:$0xff]   ;;  %v237_v2 = vld [vmem:[#allocation5 + $0x8] sm:$0xff]  }
  0x27   :  { %209 = vmatprep.subr.bf16.mxu0 %v324_v0  ;;  %225 = vmatprep.mubr.msk.bf16.mxu0 %vm325_vm0, %v324_v0  ;;  %v238_v3 = vld [vmem:[#allocation5 + $0x10] sm:$0xff]   ;;  %v239_v4 = vld [vmem:[#allocation5 + $0x18] sm:$0xff]   ;;  %v240_v5 = vld [vmem:[#allocation5 + $0x20] sm:$0xff]   ;;  %s326_s11 = smov [#allocation7]  }
  0x28   :  { %210 = vmatpush3.bf16.msra.mxu0 %v236_v1  ;;  %v241_v6 = vld [vmem:[#allocation5 + $0x28] sm:$0xff]   ;;  %v242_v7 = vld [vmem:[#allocation5 + $0x30] sm:$0xff]   ;;  %v243_v8 = vld [vmem:[#allocation5 + $0x38] sm:$0xff]   ;;  %s180_s12 = sshll.u32 %s326_s11, 4  ;;  %s181_s12 = int_to_ptr.vmem [resolvable:$true] %s180_s12 }
  0x29   :  { %211 = vmatprep.subr.bf16.mxu0 %v324_v0  ;;  %v55_v9 = vld [vmem:[#allocation2] sm:$0xff]  ;;  %s292_s13 = scalar_lea.vmem %s181_s12, 128  ;;  %p297_p3 = scmp.lt.s32.totalorder %s181_s12, %s181_s12 }
  0x2a   :  { %v56_v10 = vpack.c.bf16 %v55_v9, %v55_v9  ;;  %v190_v11 = vld [vmem:[%s395_s2] ss:$0 sm:$0xff]  ;;  %p293_p2 = scmp.ne.s32.totalorder %s181_s12, %s292_s13  ;;  %p298_p4 = scmp.lt.s32.totalorder %s292_s13, %s292_s13 }
  0x2c   :  { %212 = vmatpush3.bf16.msra.mxu0 %v237_v2  ;;  %p299_p5 = por %p298_p4, %p297_p3 }
  0x2d   :  { %213 = vmatprep.subr.bf16.mxu0 %v324_v0 }
  0x2e   :  { %p300_p6 = pnand %p299_p5, %p293_p2 }
  0x30   :  { %214 = vmatpush3.bf16.msra.mxu0 %v238_v3 }
  0x31   :  { %215 = vmatprep.subr.bf16.mxu0 %v324_v0 }
  0x34   :  { %216 = vmatpush3.bf16.msra.mxu0 %v239_v4 }
  0x35   :  { %217 = vmatprep.subr.bf16.mxu0 %v324_v0 }
  0x38   :  { %218 = vmatpush3.bf16.msra.mxu0 %v240_v5 }
  0x39   :  { %219 = vmatprep.subr.bf16.mxu0 %v324_v0 }
  0x3c   :  { %220 = vmatpush3.bf16.msra.mxu0 %v241_v6 }
  0x3d   :  { %221 = vmatprep.subr.bf16.mxu0 %v324_v0 }
  0x40   :  { %222 = vmatpush3.bf16.msra.mxu0 %v242_v7 }
  0x41   :  { %223 = vmatprep.subr.bf16.mxu0 %v324_v0 }
  0x44   :  { %224 = vmatpush3.bf16.msra.mxu0 %v243_v8 }
  0x47   :  { %226 = vmatmul.mubr.bf16.vlgmr.msra.gmra.mrb[0].mxu0 %v56_v10 }
 0x11a   :  { %v155_v12 = vpop.f32.mrb[0].mxu0 }
 0x11b   :  { %v161_v13 = vadd.f32 %v190_v11, %v155_v12  ;;  %v227_v14 = vpop.f32.mrb[1].mxu0 }
 0x11c   :  { %v158_v15 = vpop.f32.mrb[2].mxu0 }
 0x11d   :  { %v228_v16 = vpop.f32.mrb[3].mxu0  ;;  %v199_v17 = vmul.f32 -1.442695, %v161_v13 }
 0x11f   :  { %244 = vpow2.f32 %v199_v17 }
 0x129   :  { %v245_v18 = vpop.eup %244 }
 0x12a   :  { %v170_v19 = vadd.f32 1.0, %v245_v18 }
 0x12c   :  { %246 = vrcp.f32 %v170_v19 }
 0x136   :  { %v247_v20 = vpop.eup %246 }
 0x137   :  { %173 = vst [vmem:[#allocation7] sm:$0xff] %v247_v20 }
 0x138   :  { %303 = shalt.err (!%p300_p6)
}
 0x139   :  { %s304_s15 = scalar_lea.hbm %s396_s3, 128 }
 0x13a   :  { %p305_p7 = scmp.ne.s32.totalorder %s396_s3, %s304_s15  ;;  %p308_p8 = scmp.lt.u32.totalorder %s304_s15, %s396_s3 }
 0x13c   :  { %p310_p9 = pnand %p308_p8, %p305_p7 }
 0x13e   :  { %313 = shalt.err (!%p310_p9)
}
 0x13f   :  { %183 = dma.vmem_to_hbm [thread:$0]  %s181_s12, 128, %s396_s3, [#allocation4]  }
 0x140   :  { %318 = dma.done.wait [#allocation4], 128  }
 0x141   :  { %319 = vsyncadd [#allocation4], 4294967168 }
 0x142   :  { %187 = vsyncpa [#allocation3], 1 }
 0x143   :  { %188 = vsyncpa [#allocation6], 1 }
 0x144   :  { %189 = vsyncpa [#allocation4], 1 }

</bundles_post_ra>
